<compile_context>
chip_gen: v7x
topology: tpu7x:2x2x1
jax: 0.10.0
libtpu: 0.0.40
codegen_flags: <defaults>
</compile_context>

<pallas_src>
import jax
import jax.numpy as jnp
from jax.experimental import pallas as pl
from jax.experimental.pallas import tpu as pltpu

FEATURE_NUM = 128          # assumed (must be multiple of 128 or pre-padded)
HIDDEN = 300
HIDDEN_PAD = 384           # next multiple of 128 -> lane-dense hidden layer
OUT = 1
TILE_B = 512               # batch tile (multiple of 128; sized for v7x VMEM)


def _round_up(n, m):
    return ((n + m - 1) // m) * m


def net14_kernel(x_ref, w1_ref, b1_ref, w2_ref, b2_ref, o_ref):
    # Layer 1 on the MXU: bf16 inputs, f32 accumulation.
    x_bf = x_ref[...].astype(jnp.bfloat16)
    h = jnp.dot(x_bf, w1_ref[...], preferred_element_type=jnp.float32)
    h = jax.nn.sigmoid(h + b1_ref[...])                  # VPU + EUP, f32
    # Layer 2 (N=1): VPU multiply + lane reduction instead of a 1-column MXU
    # matmul.  Padded hidden units have w2 == 0, so they contribute nothing.
    out = jnp.sum(h * w2_ref[...], axis=-1, keepdims=True) + b2_ref[0, 0]
    o_ref[...] = out.astype(o_ref.dtype)


def net14_forward(x, w1p, b1p, w2_row, b2, *, tile_b=TILE_B):
    """x: (B, F) f32; w1p: (F, HP) bf16; b1p: (1, HP) f32;
    w2_row: (1, HP) f32; b2: (1, 1) f32.  Returns (B, 1) f32."""
    B, F = x.shape
    HP = w1p.shape[1]

    tb = min(tile_b, _round_up(B, 8))
    Bp = _round_up(B, tb)
    if Bp != B:
        x = jnp.pad(x, ((0, Bp - B), (0, 0)))
    num_tiles = Bp // tb

    cost = pl.CostEstimate(
        flops=2 * Bp * F * HP + 2 * Bp * HP,
        transcendentals=Bp * HP,
        bytes_accessed=Bp * F * 4 + F * HP * 2 + 2 * HP * 4 + 4 + Bp * 4,
    )

    out = pl.pallas_call(
        net14_kernel,
        out_shape=jax.ShapeDtypeStruct((Bp, OUT), jnp.float32),
        grid=(num_tiles,),
        in_specs=[
            pl.BlockSpec((tb, F), lambda i: (i, 0)),          # x: tiled on batch
            pl.BlockSpec((F, HP), lambda i: (0, 0)),          # w1: resident
            pl.BlockSpec((1, HP), lambda i: (0, 0)),          # b1: resident
            pl.BlockSpec((1, HP), lambda i: (0, 0)),          # w2 row: resident
            pl.BlockSpec(memory_space=pltpu.MemorySpace.SMEM) # b2 scalar
        ],
        out_specs=pl.BlockSpec((tb, OUT), lambda i: (i, 0)),
        compiler_params=pltpu.CompilerParams(
            dimension_semantics=("parallel",)),
        cost_estimate=cost,
    )(x, w1p, b1p, w2_row, b2)
    return out[:B]


def init_params(key):
    """Deterministic init mimicking PyTorch Linear default (uniform(-k, k))."""
    k1, k2, k3, k4 = jax.random.split(key, 4)
    bound1 = 1.0 / jnp.sqrt(FEATURE_NUM)
    bound2 = 1.0 / jnp.sqrt(HIDDEN)
    w1 = jax.random.uniform(k1, (FEATURE_NUM, HIDDEN), jnp.float32,
                            minval=-bound1, maxval=bound1)
    b1 = jax.random.uniform(k2, (HIDDEN,), jnp.float32,
                            minval=-bound1, maxval=bound1)
    w2 = jax.random.uniform(k3, (HIDDEN, OUT), jnp.float32,
                            minval=-bound2, maxval=bound2)
    b2 = jax.random.uniform(k4, (OUT,), jnp.float32,
                            minval=-bound2, maxval=bound2)
    return w1, b1, w2, b2


def prepare_params(w1, b1, w2, b2):
    """One-time packing for the kernel (NOT per call):
    pad hidden 300->384, cast W1 to bf16 for the MXU, lay W2 out as a
    lane-dense (1, HP) row, b2 as a (1, 1) SMEM scalar."""
    pad = HIDDEN_PAD - HIDDEN
    w1p = jnp.pad(w1, ((0, 0), (0, pad))).astype(jnp.bfloat16)
    b1p = jnp.pad(b1.reshape(1, HIDDEN), ((0, 0), (0, pad)))
    w2_row = jnp.pad(w2.reshape(1, HIDDEN), ((0, 0), (0, pad)))
    b2s = b2.reshape(1, 1)
    return w1p, b1p, w2_row, b2s


def reference_forward(x, w1, b1, w2, b2):
    h = jax.nn.sigmoid(x @ w1 + b1)
    return h @ w2 + b2


if __name__ == "__main__":
    key = jax.random.PRNGKey(0)
    kx, kp = jax.random.split(key)

    B = 8  # small batch
    x = jax.random.normal(kx, (B, FEATURE_NUM), jnp.float32)
    w1, b1, w2, b2 = init_params(kp)
    w1p, b1p, w2_row, b2s = prepare_params(w1, b1, w2, b2)

    out = jax.block_until_ready(net14_forward(x, w1p, b1p, w2_row, b2s))

    ref = reference_forward(x, w1, b1, w2, b2)
    assert out.shape == (B, OUT)
    # bf16 MXU inputs (f32 accumulation) -> relaxed tolerance vs. the f32 ref.
    assert jnp.allclose(out, ref, atol=2e-2, rtol=2e-2), (
        f"mismatch: max abs err {jnp.max(jnp.abs(out - ref))}")

    print("KERNEL_OK")
</pallas_src>

<mosaic_0001>
module attributes {stable_mosaic.version = 11 : i64} {
  func.func @net14_kernel(%arg0: i32, %arg1: memref<8x128xf32, #tpu.memory_space<vmem>>, %arg2: memref<128x384xbf16, #tpu.memory_space<vmem>>, %arg3: memref<1x384xf32, #tpu.memory_space<vmem>>, %arg4: memref<1x384xf32, #tpu.memory_space<vmem>>, %arg5: memref<1x1xf32, #tpu.memory_space<smem>>, %arg6: memref<8x1xf32, #tpu.memory_space<vmem>>) attributes {dimension_semantics = [#tpu.dimension_semantics<parallel>], iteration_bounds = array<i64: 1>, scalar_prefetch = 0 : i64, scratch_operands = 0 : i64, tpu.core_type = #tpu.core_type<tc>, window_params = [{transform_indices = @transform_0, window_bounds = array<i64: 8, 128>}, {pipeline_mode = #tpu.pipeline_mode<synchronous>, transform_indices = @transform_1, window_bounds = array<i64: 128, 384>}, {pipeline_mode = #tpu.pipeline_mode<synchronous>, transform_indices = @transform_2, window_bounds = array<i64: 1, 384>}, {pipeline_mode = #tpu.pipeline_mode<synchronous>, transform_indices = @transform_3, window_bounds = array<i64: 1, 384>}, {transform_indices = @transform_4, window_bounds = array<i64: 1, 1>}, {transform_indices = @transform_5, window_bounds = array<i64: 8, 1>}]} {
    %c0 = arith.constant 0 : index
    %c0_0 = arith.constant 0 : index
    %0 = vector.load %arg1[%c0, %c0_0] : memref<8x128xf32, #tpu.memory_space<vmem>>, vector<8x128xf32>
    %1 = arith.truncf %0 : vector<8x128xf32> to vector<8x128xbf16>
    %c0_1 = arith.constant 0 : index
    %c0_2 = arith.constant 0 : index
    %2 = vector.load %arg2[%c0_1, %c0_2] : memref<128x384xbf16, #tpu.memory_space<vmem>>, vector<128x384xbf16>
    %cst = arith.constant dense<0.000000e+00> : vector<8x384xf32>
    %3 = tpu.matmul %1, %2, %cst {dimension_numbers = #tpu.dot_dimension_numbers<[1], [0], [0], [1], [0, 0, 1, 1], [], []>} : vector<8x128xbf16>, vector<128x384xbf16>, vector<8x384xf32> -> vector<8x384xf32>
    %c0_3 = arith.constant 0 : index
    %c0_4 = arith.constant 0 : index
    %4 = vector.load %arg3[%c0_3, %c0_4] : memref<1x384xf32, #tpu.memory_space<vmem>>, vector<1x384xf32>
    %5 = vector.broadcast %4 : vector<1x384xf32> to vector<8x384xf32>
    %6 = arith.addf %3, %5 : vector<8x384xf32>
    %7 = arith.negf %6 : vector<8x384xf32>
    %8 = math.exp %7 : vector<8x384xf32>
    %cst_5 = arith.constant 1.000000e+00 : f32
    %9 = vector.broadcast %cst_5 : f32 to vector<8x384xf32>
    %10 = arith.addf %9, %8 : vector<8x384xf32>
    %11 = arith.divf %9, %10 : vector<8x384xf32>
    %c0_6 = arith.constant 0 : index
    %c0_7 = arith.constant 0 : index
    %12 = vector.load %arg4[%c0_6, %c0_7] : memref<1x384xf32, #tpu.memory_space<vmem>>, vector<1x384xf32>
    %13 = vector.broadcast %12 : vector<1x384xf32> to vector<8x384xf32>
    %14 = arith.mulf %11, %13 : vector<8x384xf32>
    %cst_8 = arith.constant dense<0.000000e+00> : vector<8xf32>
    %15 = vector.multi_reduction <add>, %14, %cst_8 [1] : vector<8x384xf32> to vector<8xf32>
    %16 = vector.shape_cast %15 : vector<8xf32> to vector<8x1xf32>
    %c0_9 = arith.constant 0 : index
    %c0_10 = arith.constant 0 : index
    %17 = memref.load %arg5[%c0_9, %c0_10] : memref<1x1xf32, #tpu.memory_space<smem>>
    %18 = vector.broadcast %17 : f32 to vector<8x1xf32>
    %19 = arith.addf %16, %18 : vector<8x1xf32>
    %c0_11 = arith.constant 0 : index
    %c0_12 = arith.constant 0 : index
    %20 = vector.load %arg6[%c0_11, %c0_12] : memref<8x1xf32, #tpu.memory_space<vmem>>, vector<8x1xf32>
    tpu.vector_store %arg6[%c0_11, %c0_12], %19 {strides = array<i32>} : memref<8x1xf32, #tpu.memory_space<vmem>>, vector<8x1xf32>,
    return
  }
  func.func @transform_0(%arg0: i32) -> (i32, i32) {
    %c0_i32 = arith.constant 0 : i32
    %c0_i32_0 = arith.constant 0 : i32
    return %arg0, %c0_i32 : i32, i32
  }
  func.func @transform_1(%arg0: i32) -> (i32, i32) {
    %c0_i32 = arith.constant 0 : i32
    %c0_i32_0 = arith.constant 0 : i32
    %c0_i32_1 = arith.constant 0 : i32
    return %c0_i32, %c0_i32_0 : i32, i32
  }
  func.func @transform_2(%arg0: i32) -> (i32, i32) {
    %c0_i32 = arith.constant 0 : i32
    %c0_i32_0 = arith.constant 0 : i32
    %c0_i32_1 = arith.constant 0 : i32
    return %c0_i32, %c0_i32_0 : i32, i32
  }
  func.func @transform_3(%arg0: i32) -> (i32, i32) {
    %c0_i32 = arith.constant 0 : i32
    %c0_i32_0 = arith.constant 0 : i32
    %c0_i32_1 = arith.constant 0 : i32
    return %c0_i32, %c0_i32_0 : i32, i32
  }
  func.func @transform_4(%arg0: i32) -> (i32, i32) {
    %c0_i32 = arith.constant 0 : i32
    %c0_i32_0 = arith.constant 0 : i32
    %c0_i32_1 = arith.constant 0 : i32
    return %c0_i32, %c0_i32_0 : i32, i32
  }
  func.func @transform_5(%arg0: i32) -> (i32, i32) {
    %c0_i32 = arith.constant 0 : i32
    %c0_i32_0 = arith.constant 0 : i32
    return %arg0, %c0_i32 : i32, i32
  }
}

</mosaic_0001>

<bundles_post_ra>
// kernel: tpu_custom_call.1
= control target key start
LH: loop header
LB: loop body
LE: loop exit
PB: predicated region body
PF: predicated region fallthrough
CT: control target
= control target key end

     0   :  { %11 = vsyncpa [#allocation4], 0  ;;  %s596_s0 = inlined_call_operand.hbm [shape: f32[8,128], index: 0, kind: input, shape index: {}]   ;;  %s597_s1 = inlined_call_operand.hbm [shape: bf16[128,384], index: 1, kind: input, shape index: {}]   ;;  %s598_s2 = inlined_call_operand.vmem [shape: f32[1,384], index: 2, kind: input, shape index: {}]   ;;  %s599_s3 = inlined_call_operand.vmem [shape: f32[1,384], index: 3, kind: input, shape index: {}]   ;;  %s600_s4 = inlined_call_operand.<no memory space> [shape: f32[1,1], index: 4, kind: input, shape index: {}]   ;;  %s601_s5 = inlined_call_operand.vmem [shape: f32[8,1], index: 5, kind: output, shape index: {}]  }
   0x1   :  { %12 = vsyncpa [#allocation6], 0  ;;  %s516_s18 = smov [#allocation3]   ;;  %s517_s20 = smov [#allocation5]  }
   0x2   :  { %s19_s19 = sshll.u32 %s516_s18, 4  ;;  %s28_s21 = sshll.u32 %s517_s20, 4  ;;  %s20_s19 = int_to_ptr.vmem [resolvable:$true] %s19_s19  ;;  %s553_s21 = int_to_ptr.vmem [resolvable:$true] %s28_s21 }
   0x3   :  { %s468_s24 = scalar_lea.hbm %s596_s0, 128 }
   0x4   :  { %p469_p0 = scmp.ne.s32.totalorder %s596_s0, %s468_s24  ;;  %p472_p1 = scmp.lt.u32.totalorder %s468_s24, %s596_s0 }
   0x6   :  { %p474_p2 = pnand %p472_p1, %p469_p0 }
   0x8   :  { %477 = shalt.err (!%p474_p2)
}
   0x9   :  { %s478_s29 = scalar_lea.vmem %s20_s19, 128  ;;  %p483_p4 = scmp.lt.s32.totalorder %s20_s19, %s20_s19 }
   0xa   :  { %p479_p3 = scmp.ne.s32.totalorder %s20_s19, %s478_s29  ;;  %p484_p5 = scmp.lt.s32.totalorder %s478_s29, %s478_s29 }
   0xc   :  { %p485_p6 = por %p484_p5, %p483_p4 }
   0xe   :  { %p486_p7 = pnand %p485_p6, %p479_p3 }
  0x10   :  { %489 = shalt.err (!%p486_p7)
}
  0x11   :  { %22 = dma.hbm_to_vmem [thread:$0]  %s596_s0, 128, %s20_s19, [#allocation4]  }
  0x12   :  { %s490_s9 = scalar_lea.hbm %s597_s1, 3072 }
  0x13   :  { %p491_p8 = scmp.ne.s32.totalorder %s597_s1, %s490_s9  ;;  %p494_p9 = scmp.lt.u32.totalorder %s490_s9, %s597_s1 }
  0x15   :  { %p496_p10 = pnand %p494_p9, %p491_p8 }
  0x17   :  { %499 = shalt.err (!%p496_p10)
}
  0x18   :  { %s500_s14 = scalar_lea.vmem %s553_s21, 3072  ;;  %p505_p12 = scmp.lt.s32.totalorder %s553_s21, %s553_s21 }
  0x19   :  { %p501_p11 = scmp.ne.s32.totalorder %s553_s21, %s500_s14  ;;  %p506_p13 = scmp.lt.s32.totalorder %s500_s14, %s500_s14 }
  0x1b   :  { %p507_p0 = por %p506_p13, %p505_p12 }
  0x1d   :  { %p508_p1 = pnand %p507_p0, %p501_p11 }
  0x1f   :  { %511 = shalt.err (!%p508_p1)
}
  0x20   :  { %s518_s0 = smov 192   ;;  %s519_s15 = smov 12  }
  0x21   :  { %34 = dma.hbm_to_vmem [thread:$0]  %s597_s1, 3072, %s553_s21, [#allocation6], %s518_s0, %s518_s0, %s519_s15  }
  0x22   :  { %512 = dma.done.wait [#allocation4], 128  }
  0x23   :  { %513 = vsyncadd [#allocation4], 4294967168 }
  0x24   :  { %514 = dma.done.wait [#allocation6], 3072  }
  0x25   :  { %515 = vsyncadd [#allocation6], 4294964224  ;;  %v520_v0 = vmov 0.0   ;;  %v521_v1 = vmov 0   ;;  %vm522_vm0 = vmmov 0   ;;  %v48_v25 = vld [vmem:[#allocation3] sm:$0xff]  ;;  %v84_v28 = vlaneseq }
  0x26   :  { %397 = vmatprep.subr.bf16.mxu1 %v520_v0  ;;  %259 = vmatprep.mubr.bf16.mxu0 %v521_v1  ;;  %v424_v2 = vld [vmem:[#allocation5 + $0x4] ss:$12 sps:$4 sm:$0xff]   ;;  %v426_v3 = vld [vmem:[#allocation5] ss:$12 sps:$4 sm:$0xff]   ;;  %v427_v4 = vld [vmem:[#allocation5 + $0x8] ss:$12 sps:$4 sm:$0xff]   ;;  %v49_v27 = vpack.c.bf16 %v48_v25, %v48_v25 }
  0x27   :  { %413 = vmatprep.mubr.msk.bf16.mxu1 %vm522_vm0, %v520_v0  ;;  %227 = vmatprep.subr.bf16.mxu0 %v424_v2  ;;  %v428_v5 = vld [vmem:[#allocation5 + $0x1c] ss:$12 sps:$4 sm:$0xff]   ;;  %v430_v6 = vld [vmem:[#allocation5 + $0x18] ss:$12 sps:$4 sm:$0xff]   ;;  %v431_v7 = vld [vmem:[#allocation5 + $0x20] ss:$12 sps:$4 sm:$0xff]  }
  0x28   :  { %228 = vmatpush1.bf16.msra.mxu0 %v426_v3  ;;  %398 = vmatpush3.bf16.msra.mxu1 %v427_v4  ;;  %v432_v8 = vld [vmem:[#allocation5 + $0x34] ss:$12 sps:$4 sm:$0xff]   ;;  %v434_v9 = vld [vmem:[#allocation5 + $0x30] ss:$12 sps:$4 sm:$0xff]   ;;  %v435_v10 = vld [vmem:[#allocation5 + $0x38] ss:$12 sps:$4 sm:$0xff]  }
  0x29   :  { %229 = vmatprep.subr.bf16.mxu0 %v428_v5  ;;  %399 = vmatprep.subr.bf16.mxu1 %v520_v0  ;;  %v436_v11 = vld [vmem:[#allocation5 + $0x4c] ss:$12 sps:$4 sm:$0xff]   ;;  %v438_v12 = vld [vmem:[#allocation5 + $0x48] ss:$12 sps:$4 sm:$0xff]   ;;  %v439_v13 = vld [vmem:[#allocation5 + $0x50] ss:$12 sps:$4 sm:$0xff]   ;;  %v351_v5 = vstv %s600_s4 }
  0x2a   :  { %v440_v14 = vld [vmem:[#allocation5 + $0x64] ss:$12 sps:$4 sm:$0xff]   ;;  %v442_v15 = vld [vmem:[#allocation5 + $0x60] ss:$12 sps:$4 sm:$0xff]   ;;  %v443_v16 = vld [vmem:[#allocation5 + $0x68] ss:$12 sps:$4 sm:$0xff]  }
  0x2b   :  { %v444_v17 = vld [vmem:[#allocation5 + $0x7c] ss:$12 sps:$4 sm:$0xff]   ;;  %v446_v18 = vld [vmem:[#allocation5 + $0x78] ss:$12 sps:$4 sm:$0xff]   ;;  %v447_v19 = vld [vmem:[#allocation5 + $0x80] ss:$12 sps:$4 sm:$0xff]  }
  0x2c   :  { %230 = vmatpush1.bf16.msra.mxu0 %v430_v6  ;;  %400 = vmatpush3.bf16.msra.mxu1 %v431_v7  ;;  %v448_v20 = vld [vmem:[#allocation5 + $0x94] ss:$12 sps:$4 sm:$0xff]   ;;  %v450_v21 = vld [vmem:[#allocation5 + $0x90] ss:$12 sps:$4 sm:$0xff]   ;;  %v451_v22 = vld [vmem:[#allocation5 + $0x98] ss:$12 sps:$4 sm:$0xff]  }
  0x2d   :  { %231 = vmatprep.subr.bf16.mxu0 %v432_v8  ;;  %401 = vmatprep.subr.bf16.mxu1 %v520_v0  ;;  %v452_v23 = vld [vmem:[#allocation5 + $0xac] ss:$12 sps:$4 sm:$0xff]   ;;  %v454_v24 = vld [vmem:[#allocation5 + $0xa8] ss:$12 sps:$4 sm:$0xff]   ;;  %v455_v26 = vld [vmem:[#allocation5 + $0xb0] ss:$12 sps:$4 sm:$0xff]  }
  0x2e   :  { %v85_v29 = vshrl.u32 %v84_v28, 7  ;;  %v82_v31 = vld [vmem:[%s598_s2] sm:$0x7]  ;;  %vm353_vm1 = vcmask 7168  }
  0x2f   :  { %v326_v57 = vld [vmem:[%s599_s3] sm:$0x7] }
  0x30   :  { %232 = vmatpush1.bf16.msra.mxu0 %v434_v9  ;;  %402 = vmatpush3.bf16.msra.mxu1 %v435_v10  ;;  %v86_v30 = vsub.s32 0, %v85_v29  ;;  %v94_v32 = vsub.s32 2, %v85_v29  ;;  %v90_v33 = vsub.s32 1, %v85_v29 }
  0x31   :  { %233 = vmatprep.subr.bf16.mxu0 %v436_v11  ;;  %403 = vmatprep.subr.bf16.mxu1 %v520_v0 }
  0x32   :  { %v87_v34 = vrot.slane %v82_v31, %v86_v30  ;;  %v95_v35 = vrot.slane %v82_v31, %v94_v32  ;;  %v91_v36 = vrot.slane %v82_v31, %v90_v33  ;;  %v331_v58 = vrot.slane %v326_v57, %v86_v30 }
  0x33   :  { %v335_v59 = vrot.slane %v326_v57, %v90_v33  ;;  %v339_v60 = vrot.slane %v326_v57, %v94_v32 }
  0x34   :  { %234 = vmatpush1.bf16.msra.mxu0 %v438_v12  ;;  %404 = vmatpush3.bf16.msra.mxu1 %v439_v13 }
  0x35   :  { %235 = vmatprep.subr.bf16.mxu0 %v440_v14  ;;  %405 = vmatprep.subr.bf16.mxu1 %v520_v0 }
  0x38   :  { %236 = vmatpush1.bf16.msra.mxu0 %v442_v15  ;;  %406 = vmatpush3.bf16.msra.mxu1 %v443_v16 }
  0x39   :  { %237 = vmatprep.subr.bf16.mxu0 %v444_v17  ;;  %407 = vmatprep.subr.bf16.mxu1 %v520_v0 }
  0x3c   :  { %238 = vmatpush1.bf16.msra.mxu0 %v446_v18  ;;  %408 = vmatpush3.bf16.msra.mxu1 %v447_v19 }
  0x3d   :  { %239 = vmatprep.subr.bf16.mxu0 %v448_v20  ;;  %409 = vmatprep.subr.bf16.mxu1 %v520_v0 }
  0x40   :  { %240 = vmatpush1.bf16.msra.mxu0 %v450_v21  ;;  %410 = vmatpush3.bf16.msra.mxu1 %v451_v22 }
  0x41   :  { %241 = vmatprep.subr.bf16.mxu0 %v452_v23  ;;  %411 = vmatprep.subr.bf16.mxu1 %v520_v0 }
  0x44   :  { %242 = vmatpush1.bf16.msra.mxu0 %v454_v24  ;;  %412 = vmatpush3.bf16.msra.mxu1 %v455_v26 }
  0x47   :  { %260 = vmatmul.mubr.bf16.vlgmr.msra.gmra.mrb[0].mxu0 %v49_v27  ;;  %414 = vmatmul.mubr.bf16.vlgmr.msra.gmra.mrb[0].mxu1 %v49_v27 }
 0x11a   :  { %v261_v37 = vpop.f32.mrb[0].mxu0  ;;  %v302_v39 = vpop.f32.mrb[0].mxu1 }
 0x11b   :  { %v262_v38 = vadd.f32 %v261_v37, %v87_v34  ;;  %v263_v40 = vpop.f32.mrb[1].mxu0  ;;  %v303_v41 = vadd.f32 %v302_v39, %v95_v35  ;;  %v415_v43 = vpop.f32.mrb[1].mxu1 }
 0x11c   :  { %v264_v42 = vadd.f32 %v263_v40, %v91_v36  ;;  %v265_v44 = vpop.f32.mrb[2].mxu0  ;;  %v305_v46 = vpop.f32.mrb[2].mxu1 }
 0x11d   :  { %v385_v45 = vmul.f32 -1.442695, %v262_v38  ;;  %v266_v47 = vpop.f32.mrb[3].mxu0  ;;  %v387_v48 = vmul.f32 -1.442695, %v303_v41  ;;  %v416_v50 = vpop.f32.mrb[3].mxu1 }
 0x11e   :  { %v386_v49 = vmul.f32 -1.442695, %v264_v42 }
 0x11f   :  { %456 = vpow2.f32 %v385_v45 }
 0x120   :  { %458 = vpow2.f32 %v387_v48 }
 0x121   :  { %460 = vpow2.f32 %v386_v49 }
 0x129   :  { %v457_v51 = vpop.eup %456 }
 0x12a   :  { %v459_v52 = vpop.eup %458  ;;  %v317_v53 = vadd.f32 1.0, %v457_v51 }
 0x12b   :  { %v461_v54 = vpop.eup %460  ;;  %v319_v55 = vadd.f32 1.0, %v459_v52 }
 0x12c   :  { %462 = vrcp.f32 %v317_v53  ;;  %v318_v56 = vadd.f32 1.0, %v461_v54 }
 0x12d   :  { %464 = vrcp.f32 %v319_v55 }
 0x12e   :  { %466 = vrcp.f32 %v318_v56 }
 0x136   :  { %v463_v61 = vpop.eup %462 }
 0x137   :  { %v465_v62 = vpop.eup %464  ;;  %v343_v63 = vmul.f32 %v463_v61, %v331_v58 }
 0x138   :  { %v467_v0 = vpop.eup %466  ;;  %v345_v2 = vmul.f32 %v465_v62, %v339_v60 }
 0x139   :  { %v344_v1 = vmul.f32 %v467_v0, %v335_v59 }
 0x13b   :  { %v346_v3 = vadd.f32 %v344_v1, %v343_v63 }
 0x13d   :  { %v347_v4 = vadd.f32 %v346_v3, %v345_v2 }
 0x13f   :  { %348 = vadd.xlane.f32.xlu0 %v347_v4 }
 0x1cc   :  { %v349_v6 = vpop.xlane.xlu0 %348 }
 0x1cd   :  { %v352_v7 = vadd.f32 %v351_v5, %v349_v6 }
 0x1cf   :  { %354 = vst.msk [vmem:[%s601_s5] sm:$0xff] %vm353_vm1, %v352_v7 }
 0x1d0   :  { %359 = vsyncpa [#allocation4], 1 }
 0x1d1   :  { %360 = vsyncpa [#allocation6], 1 }

</bundles_post_ra>
